<compile_context>
chip_gen: v7x
topology: tpu7x:2x2x1
jax: 0.10.0
libtpu: 0.0.40
codegen_flags: <defaults>
</compile_context>

<pallas_src>
import functools
import math

import jax
import jax.numpy as jnp
from jax.experimental import pallas as pl
from jax.experimental.pallas import tpu as pltpu

_LANE = 128
_MIB = 1 << 20


def _round_up(x, m):
    return ((x + m - 1) // m) * m


def _fused_linear_kernel(x_ref, w_ref, o_ref):
    # One (TM, D) @ (D, TN) MXU matmul per grid step, f32 accumulation.
    o_ref[...] = jnp.dot(
        x_ref[...], w_ref[...], preferred_element_type=jnp.float32
    ).astype(o_ref.dtype)


@functools.partial(jax.jit, static_argnames=("tm", "tn"))
def _fused_linear(x, w_t, *, tm, tn):
    """x: (B_pad, D), w_t: (D, K_pad); B_pad % tm == 0, K_pad % tn == 0."""
    B, D = x.shape
    D2, K = w_t.shape
    assert D == D2 and B % tm == 0 and K % tn == 0

    out_dtype = x.dtype
    itemsize = jnp.dtype(out_dtype).itemsize

    # K outer / B inner: weight block index (0, j) is constant over the inner
    # (batch) axis, so the pipeline keeps it resident in VMEM and only the
    # small x tile is re-fetched -> minimal HBM traffic for the weights.
    grid = (K // tn, B // tm)

    # Double-buffered VMEM footprint, used to size the scoped-VMEM limit.
    vmem_bytes = 2 * (tm * D + D * tn + tm * tn) * itemsize
    vmem_limit = int(min(max(2 * vmem_bytes, 32 * _MIB), 48 * _MIB))

    flops = 2 * B * D * K
    bytes_accessed = (x.size + w_t.size + B * K) * itemsize

    return pl.pallas_call(
        _fused_linear_kernel,
        out_shape=jax.ShapeDtypeStruct((B, K), out_dtype),
        grid=grid,
        in_specs=[
            pl.BlockSpec((tm, D), lambda j, i: (i, 0)),   # x: batch block, full D
            pl.BlockSpec((D, tn), lambda j, i: (0, j)),   # w: full D, lane block
        ],
        out_specs=pl.BlockSpec((tm, tn), lambda j, i: (i, j)),
        compiler_params=pltpu.CompilerParams(
            # No reduction axis (D is whole) -> both axes independent.
            dimension_semantics=("parallel", "parallel"),
            vmem_limit_bytes=vmem_limit,
        ),
        cost_estimate=pl.CostEstimate(
            flops=flops, transcendentals=0, bytes_accessed=bytes_accessed
        ),
    )(x, w_t)


class MultiPrototypes:
    """JAX/Pallas port of the PyTorch MultiPrototypes module (fused heads)."""

    def __init__(self, output_dim, nmb_prototypes, key, *,
                 dtype=jnp.bfloat16, tm_max=1024, tn_max=4096):
        self.nmb_heads = len(nmb_prototypes)
        self.nmb_prototypes = list(nmb_prototypes)
        self.output_dim = output_dim
        self.dtype = jnp.dtype(dtype)
        self._tm_max = tm_max

        # Per-head weights in PyTorch layout (k_i, D), f32 master copies.
        # nn.Linear default init: uniform(-1/sqrt(D), 1/sqrt(D)).
        keys = jax.random.split(key, self.nmb_heads)
        bound = 1.0 / math.sqrt(output_dim)
        self.weights = [
            jax.random.uniform(keys[i], (k, output_dim), dtype=jnp.float32,
                               minval=-bound, maxval=bound)
            for i, k in enumerate(self.nmb_prototypes)
        ]

        # Fuse + pre-transpose ONCE at init.  Each head occupies a
        # 128-lane-aligned column slab -> per-head output slices start on a
        # lane boundary (lane-preserving, cheap in the wrapper).
        self._head_offsets = []
        padded_blocks = []
        off = 0
        for w in self.weights:
            k = w.shape[0]
            k_al = _round_up(k, _LANE)
            self._head_offsets.append(off)
            padded_blocks.append(jnp.pad(w.T, ((0, 0), (0, k_al - k))))  # (D, k_al)
            off += k_al
        k_base = off  # multiple of 128

        # tn: multiple of 128, <= tn_max, minimizing extra K padding
        # (tie-break: larger tile -> fewer grid steps / less per-step overhead).
        best = None
        t = _LANE
        while t <= min(tn_max, max(_LANE, k_base)):
            waste = _round_up(k_base, t) - k_base
            if best is None or waste < best[0] or (waste == best[0] and t > best[1]):
                best = (waste, t)
            t += _LANE
        self._tn = best[1]
        self.k_pad = _round_up(k_base, self._tn)

        w_cat = jnp.concatenate(padded_blocks, axis=1)              # (D, k_base)
        w_cat = jnp.pad(w_cat, ((0, 0), (0, self.k_pad - k_base)))  # (D, k_pad)
        self.w_fused = w_cat.astype(self.dtype)

    def __call__(self, x):
        B, D = x.shape
        assert D == self.output_dim

        # Batch tile: 16-row granularity (bf16 packs 16 sublanes per vreg);
        # pick the candidate minimizing padded rows, tie-break larger tile.
        cands = [t for t in (16, 32, 64, 128, 256, 512, 1024) if t <= self._tm_max]
        best = None
        for t in cands:
            waste = _round_up(B, t) - B
            if best is None or waste < best[0] or (waste == best[0] and t > best[1]):
                best = (waste, t)
        tm = best[1]
        b_pad = _round_up(B, tm)

        x_p = x.astype(self.dtype)
        if b_pad != B:
            x_p = jnp.pad(x_p, ((0, b_pad - B), (0, 0)))  # zero rows -> zero outputs

        fused = _fused_linear(x_p, self.w_fused, tm=tm, tn=self._tn)
        fused = fused[:B]  # drop padded batch rows

        # Per-head slices: offsets are 128-aligned, so these are lane-preserving.
        return [
            fused[:, off:off + k]
            for off, k in zip(self._head_offsets, self.nmb_prototypes)
        ]


if __name__ == "__main__":
    key = jax.random.PRNGKey(0)
    kx, kp = jax.random.split(key)

    batch = 8
    output_dim = 32
    nmb_prototypes = [16, 24, 8]

    x = jax.random.normal(kx, (batch, output_dim), dtype=jnp.float32)

    model = MultiPrototypes(output_dim, nmb_prototypes, kp)  # bf16 compute/output
    outs = model(x)
    outs = jax.block_until_ready(outs)

    # Correctness check against plain-JAX f32 reference (PyTorch semantics).
    # Tolerance accounts for bf16 input/weight/output rounding (f32 accumulation).
    for w, o, k in zip(model.weights, outs, nmb_prototypes):
        ref = x @ w.T
        assert o.shape == (batch, k), (o.shape, (batch, k))
        assert jnp.allclose(o.astype(jnp.float32), ref, atol=3e-2, rtol=3e-2), (
            float(jnp.max(jnp.abs(o.astype(jnp.float32) - ref))))

    print("KERNEL_OK")
</pallas_src>

<mosaic_0001>
module attributes {stable_mosaic.version = 11 : i64} {
  func.func @_fused_linear_kernel(%arg0: i32, %arg1: i32, %arg2: memref<16x32xbf16, #tpu.memory_space<vmem>>, %arg3: memref<32x384xbf16, #tpu.memory_space<vmem>>, %arg4: memref<16x384xbf16, #tpu.memory_space<vmem>>) attributes {dimension_semantics = [#tpu.dimension_semantics<parallel>, #tpu.dimension_semantics<parallel>], iteration_bounds = array<i64: 1, 1>, scalar_prefetch = 0 : i64, scratch_operands = 0 : i64, tpu.core_type = #tpu.core_type<tc>, window_params = [{transform_indices = @transform_0, window_bounds = array<i64: 16, 32>}, {transform_indices = @transform_1, window_bounds = array<i64: 32, 384>}, {transform_indices = @transform_2, window_bounds = array<i64: 16, 384>}]} {
    %c0 = arith.constant 0 : index
    %c0_0 = arith.constant 0 : index
    %0 = vector.load %arg2[%c0, %c0_0] : memref<16x32xbf16, #tpu.memory_space<vmem>>, vector<16x32xbf16>
    %c0_1 = arith.constant 0 : index
    %c0_2 = arith.constant 0 : index
    %1 = vector.load %arg3[%c0_1, %c0_2] : memref<32x384xbf16, #tpu.memory_space<vmem>>, vector<32x384xbf16>
    %cst = arith.constant dense<0.000000e+00> : vector<16x384xf32>
    %2 = tpu.matmul %0, %1, %cst {dimension_numbers = #tpu.dot_dimension_numbers<[1], [0], [0], [1], [0, 0, 1, 1], [], []>} : vector<16x32xbf16>, vector<32x384xbf16>, vector<16x384xf32> -> vector<16x384xf32>
    %3 = arith.truncf %2 : vector<16x384xf32> to vector<16x384xbf16>
    %c0_3 = arith.constant 0 : index
    %c0_4 = arith.constant 0 : index
    %4 = vector.load %arg4[%c0_3, %c0_4] : memref<16x384xbf16, #tpu.memory_space<vmem>>, vector<16x384xbf16>
    tpu.vector_store %arg4[%c0_3, %c0_4], %3 {strides = array<i32>} : memref<16x384xbf16, #tpu.memory_space<vmem>>, vector<16x384xbf16>,
    return
  }
  func.func @transform_0(%arg0: i32, %arg1: i32) -> (i32, i32) {
    %c0_i32 = arith.constant 0 : i32
    %c0_i32_0 = arith.constant 0 : i32
    return %arg1, %c0_i32 : i32, i32
  }
  func.func @transform_1(%arg0: i32, %arg1: i32) -> (i32, i32) {
    %c0_i32 = arith.constant 0 : i32
    %c0_i32_0 = arith.constant 0 : i32
    return %c0_i32, %arg0 : i32, i32
  }
  func.func @transform_2(%arg0: i32, %arg1: i32) -> (i32, i32) {
    %c0_i32 = arith.constant 0 : i32
    return %arg1, %arg0 : i32, i32
  }
}

</mosaic_0001>

<bundles_post_ra>
// kernel: _fused_linear.1
= control target key start
LH: loop header
LB: loop body
LE: loop exit
PB: predicated region body
PF: predicated region fallthrough
CT: control target
= control target key end

     0   :  { %7 = vsyncpa [#allocation3], 0  ;;  %s404_s0 = inlined_call_operand.hbm [shape: bf16[16,32], index: 0, kind: input, shape index: {}]   ;;  %s405_s1 = inlined_call_operand.hbm [shape: bf16[32,384], index: 1, kind: input, shape index: {}]   ;;  %s406_s2 = inlined_call_operand.hbm [shape: bf16[16,384], index: 2, kind: output, shape index: {}]  }
   0x1   :  { %8 = vsyncpa [#allocation6], 0 }
   0x2   :  { %9 = vsyncpa [#allocation4], 0  ;;  %s337_s9 = smov [#allocation2]   ;;  %s265_s13 = scalar_lea.hbm %s404_s0, 128 }
   0x3   :  { %s15_s10 = sshll.u32 %s337_s9, 4  ;;  %p266_p0 = scmp.ne.s32.totalorder %s404_s0, %s265_s13  ;;  %s16_s10 = int_to_ptr.vmem [resolvable:$true] %s15_s10 }
   0x4   :  { %p269_p1 = scmp.lt.u32.totalorder %s265_s13, %s404_s0 }
   0x6   :  { %p271_p2 = pnand %p269_p1, %p266_p0 }
   0x8   :  { %274 = shalt.err (!%p271_p2)
}
   0x9   :  { %s275_s18 = scalar_lea.vmem %s16_s10, 128  ;;  %p280_p4 = scmp.lt.s32.totalorder %s16_s10, %s16_s10 }
   0xa   :  { %p276_p3 = scmp.ne.s32.totalorder %s16_s10, %s275_s18  ;;  %p281_p5 = scmp.lt.s32.totalorder %s275_s18, %s275_s18 }
   0xc   :  { %p282_p6 = por %p281_p5, %p280_p4 }
   0xe   :  { %p283_p7 = pnand %p282_p6, %p276_p3 }
  0x10   :  { %286 = shalt.err (!%p283_p7)
}
  0x11   :  { %s338_s19 = smov 64   ;;  %s339_s20 = smov 4  }
  0x12   :  { %21 = dma.hbm_to_vmem [thread:$0]  %s404_s0, 128, %s16_s10, [#allocation3], %s338_s19, %s338_s19, %s339_s20  }
  0x13   :  { %s340_s23 = smov [#allocation5]   ;;  %s287_s27 = scalar_lea.hbm %s405_s1, 768 }
  0x14   :  { %s27_s24 = sshll.u32 %s340_s23, 4  ;;  %p288_p8 = scmp.ne.s32.totalorder %s405_s1, %s287_s27  ;;  %s28_s24 = int_to_ptr.vmem [resolvable:$true] %s27_s24 }
  0x15   :  { %p291_p9 = scmp.lt.u32.totalorder %s287_s27, %s405_s1 }
  0x17   :  { %p293_p10 = pnand %p291_p9, %p288_p8 }
  0x19   :  { %296 = shalt.err (!%p293_p10)
}
  0x1a   :  { %s297_s4 = scalar_lea.vmem %s28_s24, 768  ;;  %p302_p12 = scmp.lt.s32.totalorder %s28_s24, %s28_s24 }
  0x1b   :  { %p298_p11 = scmp.ne.s32.totalorder %s28_s24, %s297_s4  ;;  %p303_p13 = scmp.lt.s32.totalorder %s297_s4, %s297_s4 }
  0x1d   :  { %p304_p0 = por %p303_p13, %p302_p12 }
  0x1f   :  { %p305_p1 = pnand %p304_p0, %p298_p11 }
  0x21   :  { %308 = shalt.err (!%p305_p1)
}
  0x22   :  { %s341_s0 = smov 192   ;;  %s342_s5 = smov 12  }
  0x23   :  { %33 = dma.hbm_to_vmem [thread:$0]  %s405_s1, 768, %s28_s24, [#allocation6], %s341_s0, %s341_s0, %s342_s5  }
  0x24   :  { %331 = dma.done.wait [#allocation3], 128  }
  0x25   :  { %332 = vsyncadd [#allocation3], 4294967168 }
  0x26   :  { %333 = dma.done.wait [#allocation6], 768  }
  0x27   :  { %334 = vsyncadd [#allocation6], 4294966528  ;;  %v343_v0 = vmov 0.0   ;;  %vm344_vm0 = vmmov 0   ;;  %v345_v1 = vmov 0   ;;  %v264_v8 = vld [vmem:[#allocation2] sm:$0xff]  }
  0x28   :  { %238 = vmatprep.subr.bf16.mxu1 %v343_v0  ;;  %242 = vmatprep.mubr.msk.bf16.mxu1 %vm344_vm0, %v343_v0  ;;  %v256_v2 = vld [vmem:[#allocation5 + $0x4] ss:$12 sps:$4 sm:$0xff]   ;;  %v258_v3 = vld [vmem:[#allocation5 + $0x8] ss:$12 sps:$4 sm:$0xff]   ;;  %v259_v4 = vld [vmem:[#allocation5] ss:$12 sps:$4 sm:$0xff]  }
  0x29   :  { %124 = vmatprep.mubr.bf16.mxu0 %v345_v1  ;;  %92 = vmatprep.subr.bf16.mxu0 %v256_v2  ;;  %v260_v5 = vld [vmem:[#allocation5 + $0x1c] ss:$12 sps:$4 sm:$0xff]   ;;  %v262_v6 = vld [vmem:[#allocation5 + $0x20] ss:$12 sps:$4 sm:$0xff]   ;;  %v263_v7 = vld [vmem:[#allocation5 + $0x18] ss:$12 sps:$4 sm:$0xff]  }
  0x2a   :  { %239 = vmatpush3.bf16.msra.mxu1 %v258_v3  ;;  %93 = vmatpush1.bf16.msra.mxu0 %v259_v4  ;;  %vm88_vm1 = vcmask 261120   ;;  %s346_s1 = smov [#allocation7]  }
  0x2b   :  { %240 = vmatprep.subr.bf16.mxu1 %v343_v0  ;;  %94 = vmatprep.subr.bf16.mxu0 %v260_v5  ;;  %s205_s8 = sshll.u32 %s346_s1, 4  ;;  %s206_s8 = int_to_ptr.vmem [resolvable:$true] %s205_s8 }
  0x2c   :  { %s309_s9 = scalar_lea.vmem %s206_s8, 384  ;;  %p314_p3 = scmp.lt.s32.totalorder %s206_s8, %s206_s8 }
  0x2d   :  { %p310_p2 = scmp.ne.s32.totalorder %s206_s8, %s309_s9  ;;  %p315_p4 = scmp.lt.s32.totalorder %s309_s9, %s309_s9 }
  0x2e   :  { %241 = vmatpush3.bf16.msra.mxu1 %v262_v6  ;;  %95 = vmatpush1.bf16.msra.mxu0 %v263_v7 }
  0x2f   :  { %p316_p5 = por %p315_p4, %p314_p3 }
  0x31   :  { %243 = vmatmul.mubr.msk.bf16.vlgmr.msra.gmra.mrb[0].mxu1 %vm88_vm1, %v264_v8  ;;  %225 = vmatmul.mubr.msk.bf16.vlgmr.msra.gmra.mrb[0].mxu0 %vm88_vm1, %v264_v8  ;;  %p317_p6 = pnand %p316_p5, %p310_p2 }
 0x104   :  { %v169_v9 = vpop.f32.mrb[0].mxu1  ;;  %v126_v11 = vpop.f32.mrb[0].mxu0 }
 0x105   :  { %v232_v10 = vpack.c.bf16 %v169_v9, %v169_v9  ;;  %v244_v12 = vpop.f32.mrb[1].mxu1  ;;  %v128_v13 = vpop.f32.mrb[1].mxu0 }
 0x106   :  { %v172_v14 = vpop.f32.mrb[2].mxu1  ;;  %v231_v15 = vpack.c.bf16 %v128_v13, %v126_v11  ;;  %v130_v17 = vpop.f32.mrb[2].mxu0 }
 0x107   :  { %197 = vst [vmem:[#allocation7 + $0x8] sm:$0xf] %v232_v10  ;;  %v234_v16 = vpack.c.bf16 %v172_v14, %v172_v14  ;;  %v245_v18 = vpop.f32.mrb[3].mxu1  ;;  %v132_v19 = vpop.f32.mrb[3].mxu0 }
 0x108   :  { %196 = vst [vmem:[#allocation7] sm:$0xff] %v231_v15  ;;  %v233_v20 = vpack.c.bf16 %v132_v19, %v130_v17 }
 0x109   :  { %199 = vst [vmem:[#allocation7 + $0x14] sm:$0xf] %v234_v16 }
 0x10a   :  { %198 = vst [vmem:[#allocation7 + $0xc] sm:$0xff] %v233_v20 }
 0x10b   :  { %320 = shalt.err (!%p317_p6)
}
 0x10c   :  { %s321_s12 = scalar_lea.hbm %s406_s2, 384 }
 0x10d   :  { %p322_p7 = scmp.ne.s32.totalorder %s406_s2, %s321_s12  ;;  %p325_p8 = scmp.lt.u32.totalorder %s321_s12, %s406_s2 }
 0x10f   :  { %p327_p9 = pnand %p325_p8, %p322_p7 }
 0x111   :  { %330 = shalt.err (!%p327_p9)
}
 0x112   :  { %211 = dma.vmem_to_hbm [thread:$0]  %s206_s8, 384, %s406_s2, [#allocation4], %s341_s0, %s341_s0, %s342_s5  }
 0x113   :  { %335 = dma.done.wait [#allocation4], 384  }
 0x114   :  { %336 = vsyncadd [#allocation4], 4294966912 }
 0x115   :  { %215 = vsyncpa [#allocation3], 1 }
 0x116   :  { %216 = vsyncpa [#allocation6], 1 }
 0x117   :  { %217 = vsyncpa [#allocation4], 1 }

</bundles_post_ra>
